<compile_context>
chip_gen: v7x
topology: tpu7x:2x2x1
jax: 0.10.0
libtpu: 0.0.40
codegen_flags: <defaults>
</compile_context>

<pallas_src>
import jax
import jax.numpy as jnp
from jax.experimental import pallas as pl
from jax.experimental.pallas import tpu as pltpu


def _round_up(x, m):
    return ((x + m - 1) // m) * m


def _make_fnn_kernel(num_layers):
    """Kernel closure.  refs = (x, W0, b0, W1, b1, ..., W_{L-1}, b_{L-1}, out)."""

    def kernel(*refs):
        x_ref, o_ref = refs[0], refs[-1]
        wb = refs[1:-1]
        ws, bs = wb[0::2], wb[1::2]

        # Layer 0: contract the feature axis of the natural-layout (TB, in)
        # x block against W0's feature axis: einsum('oi,bi->ob').  The result
        # comes out (out0, TB) — batch on the lane axis — and stays that way
        # for the rest of the network.
        h = jax.lax.dot_general(
            ws[0][...], x_ref[...],
            dimension_numbers=(((1,), (1,)), ((), ())),
            preferred_element_type=jnp.float32,
        )
        h = h + bs[0][...]                       # (out0, 1) broadcast over TB lanes
        if num_layers == 1:                      # degenerate: no hidden layers
            o_ref[...] = h.astype(o_ref.dtype)
            return
        h = jnp.maximum(h, 0.0)

        # Middle hidden layers: canonical (out, in) @ (in, TB) MXU matmuls.
        for i in range(1, num_layers - 1):
            h = jnp.dot(ws[i][...], h, preferred_element_type=jnp.float32)
            h = jnp.maximum(h + bs[i][...], 0.0)

        # Final (prev -> 1) layer: VPU broadcast-multiply + sublane (XLU)
        # reduce instead of a wasteful M=1 MXU matmul.  ws[-1] is (prev, 1).
        y = jnp.sum(h * ws[-1][...], axis=0, keepdims=True) + bs[-1][...]
        o_ref[...] = y.astype(o_ref.dtype)       # (1, TB): full-lane unmasked stores

    return kernel


def convert_params(params):
    """ONE-TIME conversion of PyTorch-layout params [(W (out,in), b (out,)), ...].

    Hidden-layer weights keep the native (out, in) layout (no transpose needed
    in the lane-dense formulation); biases become (out, 1) columns.  The final
    layer's weight is stored as a (prev, 1) column so the kernel can use a
    multiply + sublane-reduce instead of a 1-row matmul.
    """
    n = len(params)
    flat = []
    for i, (w, b) in enumerate(params):
        w = jnp.asarray(w, jnp.float32)
        b = jnp.asarray(b, jnp.float32)
        if i == n - 1 and n > 1:
            flat.append(w.T)                    # (prev, 1)
        else:
            flat.append(w)                      # (out, in) — unchanged
        flat.append(b.reshape(-1, 1))           # (out, 1), lane-broadcastable
    return flat


def _vmem_bytes_estimate(tb, in_dim, weights):
    """Rough per-grid-step VMEM footprint (f32), incl. double buffering."""
    tb_lane = _round_up(tb, 128)
    total = 2 * _round_up(tb, 8) * _round_up(in_dim, 128) * 4    # x block (lane-padded), 2 bufs
    total += 2 * 8 * tb_lane * 4                                 # (1, TB) out block, 2 bufs
    for w in weights[0::2]:                                      # activations + temporaries
        total += 2 * _round_up(w.shape[0], 8) * tb_lane * 4
    total += 1 << 20                                             # weight/bias blocks + slack
    return total


def fnn_forward(x, weights, *, batch_tile=16384):
    """x: (batch, in_dim) f32, natural PyTorch layout.  weights: convert_params(...)."""
    num_layers = len(weights) // 2
    batch, in_dim = x.shape

    # Batch tiling: batch is the LANE axis of the output block, so tiles must
    # be 128-aligned (or span the whole batch in one full-extent block).
    if batch <= 256:
        tb = batch                                # single full-extent block
    else:
        # >= 2 grid steps so v7x's two TensorCores both get work; 128-aligned;
        # capped by batch_tile and the VMEM budget below.
        tb = min(_round_up(batch_tile, 128), _round_up(pl.cdiv(batch, 2), 128))
    vmem_budget = 40 << 20                        # conservative: fits v7x's 64 MiB physical
    while tb > 256 and _vmem_bytes_estimate(tb, in_dim, weights) > vmem_budget:
        tb = _round_up(tb // 2, 128)
    grid = (pl.cdiv(batch, tb),)                  # partial last block handled by Pallas

    in_specs = [pl.BlockSpec((tb, in_dim), lambda i: (i, 0))]     # x read straight from HBM
    for w in weights:
        in_specs.append(pl.BlockSpec(w.shape, lambda i: (0, 0)))  # tiny, grid-resident
    out_specs = pl.BlockSpec((1, tb), lambda i: (0, i))           # lane-dense output row

    vmem_limit = int(min(max(int(_vmem_bytes_estimate(tb, in_dim, weights) * 1.5),
                             16 << 20), 48 << 20))

    out = pl.pallas_call(
        _make_fnn_kernel(num_layers),
        out_shape=jax.ShapeDtypeStruct((1, batch), x.dtype),      # exact shape, no slicing
        grid=grid,
        in_specs=in_specs,
        out_specs=out_specs,
        compiler_params=pltpu.CompilerParams(
            dimension_semantics=("parallel",),    # megacore split of the batch grid
            vmem_limit_bytes=vmem_limit,
        ),
    )(x, *weights)
    # (1, batch) and (batch, 1) share the same linear layout: this reshape is free.
    return out.reshape(batch, 1)


def init_params(key, input_dim, hidden_layers):
    """Deterministic init mirroring the module's layers (PyTorch layout: W (out,in), b (out,))."""
    dims = [input_dim] + list(hidden_layers) + [1]
    params = []
    for i in range(len(dims) - 1):
        key, kw, kb = jax.random.split(key, 3)
        fan_in, fan_out = dims[i], dims[i + 1]
        bound = 1.0 / jnp.sqrt(fan_in)
        w = jax.random.uniform(kw, (fan_out, fan_in), jnp.float32, -bound, bound)
        b = jax.random.uniform(kb, (fan_out,), jnp.float32, -bound, bound)
        params.append((w, b))
    return params


def reference_forward(x, params):
    """Pure-JAX reproduction of the original PyTorch forward pass."""
    h = x
    for i, (w, b) in enumerate(params):
        h = h @ w.T + b
        if i < len(params) - 1:
            h = jnp.maximum(h, 0.0)
    return h


if __name__ == "__main__":
    # Boston-housing style config: 13 input features, hidden layers [32, 16],
    # activation = ReLU, final output dim = 1.
    input_dim = 13
    hidden_layers = [32, 16]

    key = jax.random.PRNGKey(0)
    params = init_params(key, input_dim, hidden_layers)
    weights = convert_params(params)          # one-time, hoisted out of the call path
    forward = jax.jit(lambda xx: fnn_forward(xx, weights))

    # 1) Small batch: single full-extent block.
    key, kx = jax.random.split(key)
    x_small = jax.random.normal(kx, (8, input_dim), dtype=jnp.float32)
    out_small = jax.block_until_ready(forward(x_small))
    ref_small = reference_forward(x_small, params)
    assert out_small.shape == (8, 1)
    assert jnp.allclose(out_small, ref_small, atol=1e-4, rtol=1e-4)

    # 2) Ragged multi-tile batch: exercises 128-aligned tiling, the >=2-program
    #    grid split (v7x megacore), and the masked partial last block.
    key, kx = jax.random.split(key)
    x_big = jax.random.normal(kx, (300, input_dim), dtype=jnp.float32)
    out_big = jax.block_until_ready(forward(x_big))
    ref_big = reference_forward(x_big, params)
    assert out_big.shape == (300, 1)
    assert jnp.allclose(out_big, ref_big, atol=1e-4, rtol=1e-4)

    print("KERNEL_OK")
</pallas_src>

<mosaic_0001>
module attributes {stable_mosaic.version = 11 : i64} {
  func.func @kernel(%arg0: i32, %arg1: memref<8x13xf32, #tpu.memory_space<vmem>>, %arg2: memref<32x13xf32, #tpu.memory_space<vmem>>, %arg3: memref<32x1xf32, #tpu.memory_space<vmem>>, %arg4: memref<16x32xf32, #tpu.memory_space<vmem>>, %arg5: memref<16x1xf32, #tpu.memory_space<vmem>>, %arg6: memref<16x1xf32, #tpu.memory_space<vmem>>, %arg7: memref<1x1xf32, #tpu.memory_space<vmem>>, %arg8: memref<1x8xf32, #tpu.memory_space<vmem>>) attributes {dimension_semantics = [#tpu.dimension_semantics<parallel>], iteration_bounds = array<i64: 1>, scalar_prefetch = 0 : i64, scratch_operands = 0 : i64, tpu.core_type = #tpu.core_type<tc>, window_params = [{transform_indices = @transform_0, window_bounds = array<i64: 8, 13>}, {pipeline_mode = #tpu.pipeline_mode<synchronous>, transform_indices = @transform_1, window_bounds = array<i64: 32, 13>}, {pipeline_mode = #tpu.pipeline_mode<synchronous>, transform_indices = @transform_2, window_bounds = array<i64: 32, 1>}, {pipeline_mode = #tpu.pipeline_mode<synchronous>, transform_indices = @transform_3, window_bounds = array<i64: 16, 32>}, {pipeline_mode = #tpu.pipeline_mode<synchronous>, transform_indices = @transform_4, window_bounds = array<i64: 16, 1>}, {pipeline_mode = #tpu.pipeline_mode<synchronous>, transform_indices = @transform_5, window_bounds = array<i64: 16, 1>}, {pipeline_mode = #tpu.pipeline_mode<synchronous>, transform_indices = @transform_6, window_bounds = array<i64: 1, 1>}, {transform_indices = @transform_7, window_bounds = array<i64: 1, 8>}]} {
    %c0 = arith.constant 0 : index
    %c0_0 = arith.constant 0 : index
    %0 = vector.load %arg2[%c0, %c0_0] : memref<32x13xf32, #tpu.memory_space<vmem>>, vector<32x13xf32>
    %c0_1 = arith.constant 0 : index
    %c0_2 = arith.constant 0 : index
    %1 = vector.load %arg1[%c0_1, %c0_2] : memref<8x13xf32, #tpu.memory_space<vmem>>, vector<8x13xf32>
    %cst = arith.constant dense<0.000000e+00> : vector<32x8xf32>
    %2 = tpu.matmul %0, %1, %cst {dimension_numbers = #tpu.dot_dimension_numbers<[1], [1], [0], [0], [0, 0, 1, 0], [], []>} : vector<32x13xf32>, vector<8x13xf32>, vector<32x8xf32> -> vector<32x8xf32>
    %c0_3 = arith.constant 0 : index
    %c0_4 = arith.constant 0 : index
    %3 = vector.load %arg3[%c0_3, %c0_4] : memref<32x1xf32, #tpu.memory_space<vmem>>, vector<32x1xf32>
    %4 = vector.broadcast %3 : vector<32x1xf32> to vector<32x8xf32>
    %5 = arith.addf %2, %4 : vector<32x8xf32>
    %cst_5 = arith.constant 0.000000e+00 : f32
    %6 = vector.broadcast %cst_5 : f32 to vector<32x8xf32>
    %7 = arith.maximumf %5, %6 : vector<32x8xf32>
    %c0_6 = arith.constant 0 : index
    %c0_7 = arith.constant 0 : index
    %8 = vector.load %arg4[%c0_6, %c0_7] : memref<16x32xf32, #tpu.memory_space<vmem>>, vector<16x32xf32>
    %cst_8 = arith.constant dense<0.000000e+00> : vector<16x8xf32>
    %9 = tpu.matmul %8, %7, %cst_8 {dimension_numbers = #tpu.dot_dimension_numbers<[1], [0], [0], [1], [0, 0, 1, 1], [], []>} : vector<16x32xf32>, vector<32x8xf32>, vector<16x8xf32> -> vector<16x8xf32>
    %c0_9 = arith.constant 0 : index
    %c0_10 = arith.constant 0 : index
    %10 = vector.load %arg5[%c0_9, %c0_10] : memref<16x1xf32, #tpu.memory_space<vmem>>, vector<16x1xf32>
    %11 = vector.broadcast %10 : vector<16x1xf32> to vector<16x8xf32>
    %12 = arith.addf %9, %11 : vector<16x8xf32>
    %cst_11 = arith.constant 0.000000e+00 : f32
    %13 = vector.broadcast %cst_11 : f32 to vector<16x8xf32>
    %14 = arith.maximumf %12, %13 : vector<16x8xf32>
    %c0_12 = arith.constant 0 : index
    %c0_13 = arith.constant 0 : index
    %15 = vector.load %arg6[%c0_12, %c0_13] : memref<16x1xf32, #tpu.memory_space<vmem>>, vector<16x1xf32>
    %16 = vector.broadcast %15 : vector<16x1xf32> to vector<16x8xf32>
    %17 = arith.mulf %14, %16 : vector<16x8xf32>
    %cst_14 = arith.constant dense<0.000000e+00> : vector<8xf32>
    %18 = vector.multi_reduction <add>, %17, %cst_14 [0] : vector<16x8xf32> to vector<8xf32>
    %19 = vector.shape_cast %18 : vector<8xf32> to vector<1x8xf32>
    %c0_15 = arith.constant 0 : index
    %c0_16 = arith.constant 0 : index
    %20 = vector.load %arg7[%c0_15, %c0_16] : memref<1x1xf32, #tpu.memory_space<vmem>>, vector<1x1xf32>
    %21 = vector.broadcast %20 : vector<1x1xf32> to vector<1x8xf32>
    %22 = arith.addf %19, %21 : vector<1x8xf32>
    %c0_17 = arith.constant 0 : index
    %c0_18 = arith.constant 0 : index
    %23 = vector.load %arg8[%c0_17, %c0_18] : memref<1x8xf32, #tpu.memory_space<vmem>>, vector<1x8xf32>
    tpu.vector_store %arg8[%c0_17, %c0_18], %22 {strides = array<i32>} : memref<1x8xf32, #tpu.memory_space<vmem>>, vector<1x8xf32>,
    return
  }
  func.func @transform_0(%arg0: i32) -> (i32, i32) {
    %c0_i32 = arith.constant 0 : i32
    %c0_i32_0 = arith.constant 0 : i32
    return %arg0, %c0_i32 : i32, i32
  }
  func.func @transform_1(%arg0: i32) -> (i32, i32) {
    %c0_i32 = arith.constant 0 : i32
    %c0_i32_0 = arith.constant 0 : i32
    %c0_i32_1 = arith.constant 0 : i32
    return %c0_i32, %c0_i32_0 : i32, i32
  }
  func.func @transform_2(%arg0: i32) -> (i32, i32) {
    %c0_i32 = arith.constant 0 : i32
    %c0_i32_0 = arith.constant 0 : i32
    %c0_i32_1 = arith.constant 0 : i32
    return %c0_i32, %c0_i32_0 : i32, i32
  }
  func.func @transform_3(%arg0: i32) -> (i32, i32) {
    %c0_i32 = arith.constant 0 : i32
    %c0_i32_0 = arith.constant 0 : i32
    %c0_i32_1 = arith.constant 0 : i32
    return %c0_i32, %c0_i32_0 : i32, i32
  }
  func.func @transform_4(%arg0: i32) -> (i32, i32) {
    %c0_i32 = arith.constant 0 : i32
    %c0_i32_0 = arith.constant 0 : i32
    %c0_i32_1 = arith.constant 0 : i32
    return %c0_i32, %c0_i32_0 : i32, i32
  }
  func.func @transform_5(%arg0: i32) -> (i32, i32) {
    %c0_i32 = arith.constant 0 : i32
    %c0_i32_0 = arith.constant 0 : i32
    %c0_i32_1 = arith.constant 0 : i32
    return %c0_i32, %c0_i32_0 : i32, i32
  }
  func.func @transform_6(%arg0: i32) -> (i32, i32) {
    %c0_i32 = arith.constant 0 : i32
    %c0_i32_0 = arith.constant 0 : i32
    %c0_i32_1 = arith.constant 0 : i32
    return %c0_i32, %c0_i32_0 : i32, i32
  }
  func.func @transform_7(%arg0: i32) -> (i32, i32) {
    %c0_i32 = arith.constant 0 : i32
    %c0_i32_0 = arith.constant 0 : i32
    return %c0_i32, %arg0 : i32, i32
  }
}

</mosaic_0001>

<bundles_post_ra>
// kernel: _lambda_.1
= control target key start
LH: loop header
LB: loop body
LE: loop exit
PB: predicated region body
PF: predicated region fallthrough
CT: control target
= control target key end

     0   :  { %s727_s0 = inlined_call_operand.hbm [shape: f32[8,13], index: 0, kind: input, shape index: {}]   ;;  %s728_s1 = inlined_call_operand.hbm [shape: f32[32,13], index: 1, kind: input, shape index: {}]   ;;  %s729_s2 = inlined_call_operand.hbm [shape: f32[32,1], index: 2, kind: input, shape index: {}]   ;;  %s730_s3 = inlined_call_operand.hbm [shape: f32[16,32], index: 3, kind: input, shape index: {}]   ;;  %s731_s4 = inlined_call_operand.hbm [shape: f32[16,1], index: 4, kind: input, shape index: {}]   ;;  %s732_s5 = inlined_call_operand.vmem [shape: f32[16,1], index: 5, kind: input, shape index: {}]   ;;  %s733_s6 = inlined_call_operand.<no memory space> [shape: f32[1,1], index: 6, kind: input, shape index: {}]   ;;  %s734_s7 = inlined_call_operand.hbm [shape: f32[1,8], index: 7, kind: output, shape index: {}]  }
   0x1   :  { %v12_v0 = vstv %s733_s6 }
   0x2   :  { %13 = vst [vmem:[#allocation2] sm:$0x1] %v12_v0 }
   0x3   :  { %14 = vsyncpa [#allocation4], 0 }
   0x4   :  { %15 = vsyncpa [#allocation7], 0 }
   0x5   :  { %16 = vsyncpa [#allocation10], 0 }
   0x6   :  { %17 = vsyncpa [#allocation5], 0  ;;  %s577_s26 = smov [#allocation6]   ;;  %s437_s30 = scalar_lea.hbm %s728_s1, 512 }
   0x7   :  { %s33_s27 = sshll.u32 %s577_s26, 4  ;;  %p438_p0 = scmp.ne.s32.totalorder %s728_s1, %s437_s30  ;;  %s34_s27 = int_to_ptr.vmem [resolvable:$true] %s33_s27 }
   0x8   :  { %p441_p1 = scmp.lt.u32.totalorder %s437_s30, %s728_s1 }
   0xa   :  { %p443_p2 = pnand %p441_p1, %p438_p0 }
   0xc   :  { %446 = shalt.err (!%p443_p2)
}
   0xd   :  { %s447_s6 = scalar_lea.vmem %s34_s27, 512  ;;  %p452_p4 = scmp.lt.s32.totalorder %s34_s27, %s34_s27 }
   0xe   :  { %p448_p3 = scmp.ne.s32.totalorder %s34_s27, %s447_s6  ;;  %p453_p5 = scmp.lt.s32.totalorder %s447_s6, %s447_s6 }
  0x10   :  { %p454_p6 = por %p453_p5, %p452_p4 }
  0x12   :  { %p455_p7 = pnand %p454_p6, %p448_p3 }
  0x14   :  { %458 = shalt.err (!%p455_p7)
}
  0x15   :  { %s578_s12 = smov 128   ;;  %s579_s13 = smov 8  }
  0x16   :  { %39 = dma.hbm_to_vmem [thread:$0]  %s728_s1, 512, %s34_s27, [#allocation7], %s578_s12, %s578_s12, %s579_s13  }
  0x17   :  { %s580_s16 = smov [#allocation9]   ;;  %s581_s18 = smov [#allocation3]  }
  0x18   :  { %s57_s17 = sshll.u32 %s580_s16, 4  ;;  %s24_s19 = sshll.u32 %s581_s18, 4  ;;  %s58_s17 = int_to_ptr.vmem [resolvable:$true] %s57_s17  ;;  %s25_s19 = int_to_ptr.vmem [resolvable:$true] %s24_s19 }
  0x19   :  { %s459_s22 = scalar_lea.hbm %s730_s3, 256 }
  0x1a   :  { %p460_p8 = scmp.ne.s32.totalorder %s730_s3, %s459_s22  ;;  %p463_p9 = scmp.lt.u32.totalorder %s459_s22, %s730_s3 }
  0x1c   :  { %p465_p10 = pnand %p463_p9, %p460_p8 }
  0x1e   :  { %468 = shalt.err (!%p465_p10)
}
  0x1f   :  { %s469_s1 = scalar_lea.vmem %s58_s17, 256  ;;  %p474_p12 = scmp.lt.s32.totalorder %s58_s17, %s58_s17 }
  0x20   :  { %p470_p11 = scmp.ne.s32.totalorder %s58_s17, %s469_s1  ;;  %p475_p13 = scmp.lt.s32.totalorder %s469_s1, %s469_s1 }
  0x22   :  { %p476_p0 = por %p475_p13, %p474_p12 }
  0x24   :  { %p477_p1 = pnand %p476_p0, %p470_p11 }
  0x26   :  { %480 = shalt.err (!%p477_p1)
}
  0x27   :  { %63 = dma.hbm_to_vmem [thread:$0]  %s730_s3, 256, %s58_s17, [#allocation10], %s578_s12, %s578_s12, %s579_s13  }
  0x28   :  { %s481_s8 = scalar_lea.hbm %s727_s0, 128 }
  0x29   :  { %p482_p2 = scmp.ne.s32.totalorder %s727_s0, %s481_s8  ;;  %p485_p3 = scmp.lt.u32.totalorder %s481_s8, %s727_s0 }
  0x2b   :  { %p487_p4 = pnand %p485_p3, %p482_p2 }
  0x2d   :  { %490 = shalt.err (!%p487_p4)
}
  0x2e   :  { %s491_s14 = scalar_lea.vmem %s25_s19, 128  ;;  %p496_p6 = scmp.lt.s32.totalorder %s25_s19, %s25_s19 }
  0x2f   :  { %p492_p5 = scmp.ne.s32.totalorder %s25_s19, %s491_s14  ;;  %p497_p7 = scmp.lt.s32.totalorder %s491_s14, %s491_s14 }
  0x31   :  { %p498_p8 = por %p497_p7, %p496_p6 }
  0x33   :  { %p499_p9 = pnand %p498_p8, %p492_p5 }
  0x35   :  { %502 = shalt.err (!%p499_p9)
}
  0x36   :  { %27 = dma.hbm_to_vmem [thread:$0]  %s727_s0, 128, %s25_s19, [#allocation4]  }
  0x37   :  { %s582_s16 = smov [#allocation8]   ;;  %s583_s18 = smov [#allocation11]  }
  0x38   :  { %s45_s17 = sshll.u32 %s582_s16, 4  ;;  %s69_s20 = sshll.u32 %s583_s18, 4  ;;  %s46_s17 = int_to_ptr.vmem [resolvable:$true] %s45_s17  ;;  %s70_s20 = int_to_ptr.vmem [resolvable:$true] %s69_s20 }
  0x39   :  { %s503_s23 = scalar_lea.hbm %s729_s2, 512 }
  0x3a   :  { %p504_p10 = scmp.ne.s32.totalorder %s729_s2, %s503_s23  ;;  %p507_p11 = scmp.lt.u32.totalorder %s503_s23, %s729_s2 }
  0x3c   :  { %p509_p12 = pnand %p507_p11, %p504_p10 }
  0x3e   :  { %512 = shalt.err (!%p509_p12)
}
  0x3f   :  { %s513_s0 = scalar_lea.vmem %s46_s17, 512  ;;  %p518_p0 = scmp.lt.s32.totalorder %s46_s17, %s46_s17 }
  0x40   :  { %p514_p13 = scmp.ne.s32.totalorder %s46_s17, %s513_s0  ;;  %p519_p1 = scmp.lt.s32.totalorder %s513_s0, %s513_s0 }
  0x42   :  { %p520_p2 = por %p519_p1, %p518_p0 }
  0x44   :  { %p521_p3 = pnand %p520_p2, %p514_p13 }
  0x46   :  { %524 = shalt.err (!%p521_p3)
}
  0x47   :  { %51 = dma.hbm_to_vmem [thread:$0]  %s729_s2, 512, %s46_s17, [#allocation7], %s578_s12, %s578_s12, %s579_s13  }
  0x48   :  { %s525_s30 = scalar_lea.hbm %s731_s4, 256 }
  0x49   :  { %p526_p4 = scmp.ne.s32.totalorder %s731_s4, %s525_s30  ;;  %p529_p5 = scmp.lt.u32.totalorder %s525_s30, %s731_s4 }
  0x4b   :  { %p531_p6 = pnand %p529_p5, %p526_p4 }
  0x4d   :  { %534 = shalt.err (!%p531_p6)
}
  0x4e   :  { %s535_s6 = scalar_lea.vmem %s70_s20, 256  ;;  %p540_p8 = scmp.lt.s32.totalorder %s70_s20, %s70_s20 }
  0x4f   :  { %p536_p7 = scmp.ne.s32.totalorder %s70_s20, %s535_s6  ;;  %p541_p9 = scmp.lt.s32.totalorder %s535_s6, %s535_s6 }
  0x51   :  { %p542_p10 = por %p541_p9, %p540_p8 }
  0x53   :  { %p543_p11 = pnand %p542_p10, %p536_p7 }
  0x55   :  { %546 = shalt.err (!%p543_p11)
}
  0x56   :  { %75 = dma.hbm_to_vmem [thread:$0]  %s731_s4, 256, %s70_s20, [#allocation10], %s578_s12, %s578_s12, %s579_s13  }
  0x57   :  { %569 = dma.done.wait [#allocation4], 128  }
  0x58   :  { %570 = vsyncadd [#allocation4], 4294967168 }
  0x59   :  { %571 = dma.done.wait [#allocation7], 1024  }
  0x5a   :  { %572 = vsyncadd [#allocation7], 4294966272 }
  0x5b   :  { %573 = dma.done.wait [#allocation10], 512  }
  0x5c   :  { %574 = vsyncadd [#allocation10], 4294966784  ;;  %v584_v1 = vmov 0   ;;  %vm124_vm0 = vcmask 105472   ;;  %v99_v2 = vld [vmem:[#allocation3] sm:$0xff]  ;;  %v95_v3 = vld [vmem:[#allocation6] sm:$0xff]  ;;  %v357_v50 = vlaneseq }
  0x5d   :  { %435 = vset.pattern.permute.xlu0 %v584_v1  ;;  %436 = vset.pattern.permute.xlu1 %v584_v1  ;;  %v100_v4 = vld [vmem:[#allocation8] sm:$0xff]  ;;  %v96_v5 = vld [vmem:[#allocation6 + $0x8] sm:$0xff]  ;;  %v102_v6 = vld [vmem:[#allocation8 + $0x10] sm:$0xff]  ;;  %vm243_vm1 = vcmask 261120   ;;  %vm341_vm2 = vcmask 64512   ;;  %vm362_vm3 = vcmask 57344  }
  0x5e   :  { %399 = vmatprep.subr.msk.mxu0 %vm124_vm0, %v99_v2  ;;  %401 = vmatprep.mubr.msk.f32.mxu0 %vm124_vm0, %v95_v3  ;;  %v97_v7 = vld [vmem:[#allocation6 + $0x10] sm:$0xff]  ;;  %v101_v8 = vld [vmem:[#allocation8 + $0x8] sm:$0xff]  ;;  %v103_v9 = vld [vmem:[#allocation8 + $0x18] sm:$0xff]  ;;  %v358_v53 = vshrl.u32 %v357_v50, 7 }
  0x5f   :  { %400 = vmatpush3.xpose.msk.msra.mxu0 %vm124_vm0, %v99_v2  ;;  %106 = vperm.xlu0 %435, %v100_v4   ;;  %v98_v10 = vld [vmem:[#allocation6 + $0x18] sm:$0xff]  ;;  %v231_v11 = vld [vmem:[#allocation11] sm:$0xff]  ;;  %v327_v13 = vld [vmem:[%s732_s5] sm:$0xff] }
  0x60   :  { %116 = vperm.xlu1 %436, %v102_v6   ;;  %v232_v12 = vld [vmem:[#allocation11 + $0x8] sm:$0xff]  ;;  %v328_v14 = vld [vmem:[%s732_s5 + $0x8] sm:$0xff]  ;;  %v351_v15 = vld [vmem:[#allocation2] sm:$0x1]  ;;  %v359_v56 = vsub.s32 0, %v358_v53  ;;  %s585_s5 = smov [#allocation12]  }
  0x61   :  { %v229_v16 = vld [vmem:[#allocation9] sm:$0xff]  ;;  %v230_v35 = vld [vmem:[#allocation9 + $0x8] sm:$0xff]  ;;  %s370_s15 = sshll.u32 %s585_s5, 4  ;;  %s371_s15 = int_to_ptr.vmem [resolvable:$true] %s370_s15 }
  0x62   :  { %402 = vmatmul.mubr.msk.f32.vlgmr.msra.gmra.mrb[0].mxu0 %vm124_vm0, %v96_v5  ;;  %415 = vmatprep.mubr.msk.f32.mxu1 %vm243_vm1, %v229_v16  ;;  %s547_s16 = scalar_lea.vmem %s371_s15, 16  ;;  %s551_s17 = scalar_lea.vmem %s371_s15, 32 }
  0x63   :  { %404 = vmatprep.mubr.msk.f32.mxu0 %vm124_vm0, %v97_v7  ;;  %111 = vperm.xlu0 %435, %v101_v8   ;;  %p548_p12 = scmp.ne.s32.totalorder %s371_s15, %s547_s16  ;;  %p552_p13 = scmp.lt.s32.totalorder %s371_s15, %s371_s15 }
  0x64   :  { %121 = vperm.xlu1 %436, %v103_v9   ;;  %p553_p0 = scmp.lt.s32.totalorder %s551_s17, %s547_s16 }
  0x66   :  { %405 = vmatmul.mubr.msk.f32.gmra.mrb[2].mxu0 %vm124_vm0, %v98_v10  ;;  %p554_p1 = por %p553_p0, %p552_p13 }
  0x67   :  { %235 = vperm.xlu0 %435, %v231_v11  }
  0x68   :  { %240 = vperm.xlu1 %436, %v232_v12   ;;  %p555_p2 = pnand %p554_p1, %p548_p12 }
  0x6b   :  { %331 = vperm.xlu0 %435, %v327_v13  }
  0x6c   :  { %336 = vperm.xlu1 %436, %v328_v14  }
  0x6f   :  { %354 = vperm.xlu0 %435, %v351_v15  }
  0xde   :  { %v107_v17 = vpop.permute.xlu0 %106 }
  0xdf   :  { %v117_v18 = vpop.permute.xlu1 %116 }
  0xe2   :  { %v112_v19 = vpop.permute.xlu0 %111 }
  0xe3   :  { %v122_v25 = vpop.permute.xlu1 %121 }
  0xe6   :  { %v236_v37 = vpop.permute.xlu0 %235 }
  0xe7   :  { %v241_v36 = vpop.permute.xlu1 %240 }
  0xea   :  { %v332_v45 = vpop.permute.xlu0 %331 }
  0xeb   :  { %v337_v43 = vpop.permute.xlu1 %336 }
  0xee   :  { %v355_v58 = vpop.permute.xlu0 %354 }
  0xef   :  { %v360_v60 = vrot.slane %v355_v58, %v359_v56 }
 0x135   :  { %v403_v20 = vpop.f32.mrb[0].mxu0 }
 0x136   :  { %v212_v21 = vadd.f32 %v403_v20, %v112_v19  ;;  %v206_v22 = vpop.f32.mrb[1].mxu0 }
 0x137   :  { %v207_v23 = vadd.f32 %v206_v22, %v107_v17 }
 0x138   :  { %v226_v24 = vmax.f32 %v212_v21, 0.0 }
 0x139   :  { %v225_v26 = vmax.f32 %v207_v23, 0.0  ;;  %v406_v27 = vpop.f32.mrb[2].mxu0 }
 0x13a   :  { %v222_v28 = vadd.f32 %v406_v27, %v122_v25  ;;  %v216_v29 = vpop.f32.mrb[3].mxu0 }
 0x13b   :  { %v217_v30 = vadd.f32 %v216_v29, %v117_v18  ;;  %v418_v31 = vpack.c.bf16 %v226_v24, %v225_v26 }
 0x13c   :  { %v228_v32 = vmax.f32 %v222_v28, 0.0 }
 0x13d   :  { %v227_v33 = vmax.f32 %v217_v30, 0.0  ;;  %419 = vmatprep.subr.bf16.mxu1 %v418_v31 }
 0x13e   :  { %421 = vmatpush3.bf16.msra.mxu1 %v418_v31 }
 0x13f   :  { %v422_v34 = vpack.c.bf16 %v228_v32, %v227_v33 }
 0x141   :  { %423 = vmatprep.subr.bf16.mxu1 %v422_v34 }
 0x142   :  { %425 = vmatpush3.bf16.msra.mxu1 %v422_v34 }
 0x145   :  { %416 = vmatmul.mubr.msk.f32.vlgmr.msra.gmra.mrb[0].mxu1 %vm243_vm1, %v230_v35 }
 0x218   :  { %v417_v38 = vpop.f32.mrb[0].mxu1 }
 0x219   :  { %v322_v39 = vadd.f32 %v417_v38, %v241_v36  ;;  %v316_v40 = vpop.f32.mrb[1].mxu1 }
 0x21a   :  { %v317_v41 = vadd.f32 %v316_v40, %v236_v37 }
 0x21b   :  { %v326_v42 = vmax.f32 %v322_v39, 0.0 }
 0x21c   :  { %v325_v44 = vmax.f32 %v317_v41, 0.0 }
 0x21d   :  { %v340_v46 = vmul.f32 %v337_v43, %v326_v42 }
 0x21e   :  { %v339_v47 = vmul.f32 %v332_v45, %v325_v44 }
 0x21f   :  { %v343_v48 = vsel %vm341_vm2, %v340_v46, 0.0 }
 0x220   :  { %v342_v49 = vsel %vm341_vm2, %v339_v47, 0.0 }
 0x221   :  { %v344_v51 = vadd.f32 %v343_v48, %v342_v49 }
 0x223   :  { %v345_v52 = vrot.slane %v344_v51, 4 }
 0x225   :  { %v346_v54 = vadd.f32 %v345_v52, %v344_v51 }
 0x227   :  { %v347_v55 = vrot.slane %v346_v54, 2 }
 0x229   :  { %v348_v57 = vadd.f32 %v347_v55, %v346_v54 }
 0x22b   :  { %v349_v59 = vrot.slane %v348_v57, 1 }
 0x22d   :  { %v350_v61 = vadd.f32 %v349_v59, %v348_v57 }
 0x22f   :  { %v361_v62 = vadd.f32 %v360_v60, %v350_v61 }
 0x231   :  { %363 = vst.msk [vmem:[#allocation12] sm:$0x1] %vm362_vm3, %v361_v62 }
 0x232   :  { %558 = shalt.err (!%p555_p2)
}
 0x233   :  { %s559_s21 = scalar_lea.hbm %s734_s7, 16 }
 0x234   :  { %p560_p3 = scmp.ne.s32.totalorder %s734_s7, %s559_s21  ;;  %p563_p4 = scmp.lt.u32.totalorder %s559_s21, %s734_s7 }
 0x236   :  { %p565_p5 = pnand %p563_p4, %p560_p3 }
 0x238   :  { %568 = shalt.err (!%p565_p5)
}
 0x239   :  { %373 = dma.vmem_to_hbm [thread:$0]  %s371_s15, 16, %s734_s7, [#allocation5]  }
 0x23a   :  { %575 = dma.done.wait [#allocation5], 16  }
 0x23b   :  { %576 = vsyncadd [#allocation5], 4294967280 }
 0x23c   :  { %377 = vsyncpa [#allocation4], 1 }
 0x23d   :  { %378 = vsyncpa [#allocation7], 1 }
 0x23e   :  { %379 = vsyncpa [#allocation10], 1 }
 0x23f   :  { %380 = vsyncpa [#allocation5], 1 }

</bundles_post_ra>
